<compile_context>
chip_gen: v7x
topology: tpu7x:2x2x1
jax: 0.10.0
libtpu: 0.0.40
codegen_flags: <defaults>
</compile_context>

<pallas_src>
import jax
import jax.numpy as jnp
from jax.experimental import pallas as pl


def _mul_bcast_kernel(x_ref, s_ref, o_ref):
    # x_ref: (NC, HW) native NCHW-flattened tile.
    # s_ref: (NC, 1) per-channel scale column -> broadcasts along the lane axis.
    o_ref[...] = x_ref[...] * s_ref[...]


def _broadcast_mul_impl(x, s):
    """x: (N, C, H, W), s: (N, C, 1, 1) -> x * s, computed in the native
    (N*C, H*W) layout with a single full-extent block."""
    N, C, H, W = x.shape
    NC, HW = N * C, H * W

    x2d = x.reshape(NC, HW)   # bitcast under jit; channels on sublanes
    s2d = s.reshape(NC, 1)    # per-channel scale column

    out2d = pl.pallas_call(
        _mul_bcast_kernel,
        out_shape=jax.ShapeDtypeStruct((NC, HW), x.dtype),
        grid=(1,),
        in_specs=[
            pl.BlockSpec((NC, HW), lambda i: (0, 0)),
            pl.BlockSpec((NC, 1), lambda i: (0, 0)),
        ],
        out_specs=pl.BlockSpec((NC, HW), lambda i: (0, 0)),
        # Output reuses x's buffer (x is donated by the jit wrapper below).
        input_output_aliases={0: 0},
    )(x2d, s2d)

    return out2d.reshape(N, C, H, W)


# jit so reshapes are free bitcasts and the buffer alias is honored; donate x
# so the pallas_call can truly write in place instead of forcing a copy.
broadcast_mul = jax.jit(_broadcast_mul_impl, donate_argnums=(0,))


if __name__ == "__main__":
    key = jax.random.PRNGKey(0)
    k1, k2 = jax.random.split(key)
    # Shapes from the module's forward: x299 [1,1152,7,7], x304 [1,1152,1,1]
    x299 = jax.random.normal(k1, (1, 1152, 7, 7), dtype=jnp.float32)
    x304 = jax.random.normal(k2, (1, 1152, 1, 1), dtype=jnp.float32)

    # Reference computed BEFORE the kernel call, since x299 is donated.
    ref = x299 * x304

    out = broadcast_mul(x299, x304)
    jax.block_until_ready(out)

    assert out.shape == (1, 1152, 7, 7)
    assert jnp.allclose(out, ref, atol=1e-6, rtol=1e-6)

    print("KERNEL_OK")
</pallas_src>

<mosaic_0001>
module attributes {stable_mosaic.version = 11 : i64} {
  func.func @_mul_bcast_kernel(%arg0: i32, %arg1: memref<1152x49xf32, #tpu.memory_space<vmem>>, %arg2: memref<1152x1xf32, #tpu.memory_space<vmem>>, %arg3: memref<1152x49xf32, #tpu.memory_space<vmem>>) attributes {dimension_semantics = [#tpu.dimension_semantics<arbitrary>], iteration_bounds = array<i64: 1>, scalar_prefetch = 0 : i64, scratch_operands = 0 : i64, tpu.core_type = #tpu.core_type<tc>, window_params = [{pipeline_mode = #tpu.pipeline_mode<synchronous>, transform_indices = @transform_0, window_bounds = array<i64: 1152, 49>}, {pipeline_mode = #tpu.pipeline_mode<synchronous>, transform_indices = @transform_1, window_bounds = array<i64: 1152, 1>}, {pipeline_mode = #tpu.pipeline_mode<synchronous>, transform_indices = @transform_2, window_bounds = array<i64: 1152, 49>}]} {
    %c0 = arith.constant 0 : index
    %c0_0 = arith.constant 0 : index
    %0 = vector.load %arg1[%c0, %c0_0] : memref<1152x49xf32, #tpu.memory_space<vmem>>, vector<1152x49xf32>
    %c0_1 = arith.constant 0 : index
    %c0_2 = arith.constant 0 : index
    %1 = vector.load %arg2[%c0_1, %c0_2] : memref<1152x1xf32, #tpu.memory_space<vmem>>, vector<1152x1xf32>
    %2 = vector.broadcast %1 : vector<1152x1xf32> to vector<1152x49xf32>
    %3 = arith.mulf %0, %2 : vector<1152x49xf32>
    %c0_3 = arith.constant 0 : index
    %c0_4 = arith.constant 0 : index
    %4 = vector.load %arg3[%c0_3, %c0_4] : memref<1152x49xf32, #tpu.memory_space<vmem>>, vector<1152x49xf32>
    tpu.vector_store %arg3[%c0_3, %c0_4], %3 {strides = array<i32>} : memref<1152x49xf32, #tpu.memory_space<vmem>>, vector<1152x49xf32>,
    return
  }
  func.func @transform_0(%arg0: i32) -> (i32, i32) {
    %c0_i32 = arith.constant 0 : i32
    %c0_i32_0 = arith.constant 0 : i32
    %c0_i32_1 = arith.constant 0 : i32
    return %c0_i32, %c0_i32_0 : i32, i32
  }
  func.func @transform_1(%arg0: i32) -> (i32, i32) {
    %c0_i32 = arith.constant 0 : i32
    %c0_i32_0 = arith.constant 0 : i32
    %c0_i32_1 = arith.constant 0 : i32
    return %c0_i32, %c0_i32_0 : i32, i32
  }
  func.func @transform_2(%arg0: i32) -> (i32, i32) {
    %c0_i32 = arith.constant 0 : i32
    %c0_i32_0 = arith.constant 0 : i32
    %c0_i32_1 = arith.constant 0 : i32
    return %c0_i32, %c0_i32_0 : i32, i32
  }
}

</mosaic_0001>

<bundles_post_ra>
// kernel: _broadcast_mul_impl.1
= control target key start
LH: loop header
LB: loop body
LE: loop exit
PB: predicated region body
PF: predicated region fallthrough
CT: control target
= control target key end

     0   :  { %v1315_v0 = vmov 0   ;;  %vm1163_vm0 = vcmask 400384   ;;  %s2771_s1 = inlined_call_operand.vmem [shape: f32[1152,1], index: 1, kind: input, shape index: {}]   ;;  %s2772_s0 = inlined_call_operand.vmem [shape: f32[1152,49], index: 0, kind: input, shape index: {}, may-alias: {0,2}]   ;;  %s2773_s2 = inlined_call_operand.vmem [shape: f32[1152,49], index: 2, kind: output, shape index: {}, may-alias: {0,2}]  }
   0x1   :  { %1314 = vset.pattern.permute.xlu1 %v1315_v0  ;;  %1313 = vset.pattern.permute.xlu0 %v1315_v0  ;;  %v157_v1 = vld [vmem:[%s2771_s1 + $0x10] sm:$0xff]  ;;  %v155_v2 = vld [vmem:[%s2771_s1] sm:$0xff]  ;;  %v158_v3 = vld [vmem:[%s2771_s1 + $0x18] sm:$0xff] }
   0x2   :  { %311 = vperm.xlu1 %1314, %v157_v1   ;;  %301 = vperm.xlu0 %1313, %v155_v2   ;;  %v156_v4 = vld [vmem:[%s2771_s1 + $0x8] sm:$0xff]  ;;  %v159_v6 = vld [vmem:[%s2771_s1 + $0x20] sm:$0xff]  ;;  %v162_v7 = vld [vmem:[%s2771_s1 + $0x38] sm:$0xff] }
   0x3   :  { %v160_v5 = vld [vmem:[%s2771_s1 + $0x28] sm:$0xff]  ;;  %v161_v8 = vld [vmem:[%s2771_s1 + $0x30] sm:$0xff]  ;;  %v163_v10 = vld [vmem:[%s2771_s1 + $0x40] sm:$0xff] }
   0x4   :  { %v164_v9 = vld [vmem:[%s2771_s1 + $0x48] sm:$0xff]  ;;  %v166_v11 = vld [vmem:[%s2771_s1 + $0x58] sm:$0xff]  ;;  %v165_v12 = vld [vmem:[%s2771_s1 + $0x50] sm:$0xff] }
   0x5   :  { %v168_v13 = vld [vmem:[%s2771_s1 + $0x68] sm:$0xff]  ;;  %v167_v14 = vld [vmem:[%s2771_s1 + $0x60] sm:$0xff]  ;;  %v170_v15 = vld [vmem:[%s2771_s1 + $0x78] sm:$0xff] }
   0x6   :  { %316 = vperm.xlu1 %1314, %v158_v3   ;;  %306 = vperm.xlu0 %1313, %v156_v4   ;;  %v169_v16 = vld [vmem:[%s2771_s1 + $0x70] sm:$0xff]  ;;  %v172_v17 = vld [vmem:[%s2771_s1 + $0x88] sm:$0xff]  ;;  %v171_v18 = vld [vmem:[%s2771_s1 + $0x80] sm:$0xff] }
   0x7   :  { %v174_v19 = vld [vmem:[%s2771_s1 + $0x98] sm:$0xff]  ;;  %v173_v20 = vld [vmem:[%s2771_s1 + $0x90] sm:$0xff]  ;;  %v176_v21 = vld [vmem:[%s2771_s1 + $0xa8] sm:$0xff] }
   0x8   :  { %v175_v22 = vld [vmem:[%s2771_s1 + $0xa0] sm:$0xff]  ;;  %v178_v23 = vld [vmem:[%s2771_s1 + $0xb8] sm:$0xff]  ;;  %v177_v24 = vld [vmem:[%s2771_s1 + $0xb0] sm:$0xff] }
   0x9   :  { %v180_v25 = vld [vmem:[%s2771_s1 + $0xc8] sm:$0xff]  ;;  %v179_v26 = vld [vmem:[%s2771_s1 + $0xc0] sm:$0xff]  ;;  %v182_v27 = vld [vmem:[%s2771_s1 + $0xd8] sm:$0xff] }
   0xa   :  { %326 = vperm.xlu1 %1314, %v160_v5   ;;  %321 = vperm.xlu0 %1313, %v159_v6   ;;  %v181_v28 = vld [vmem:[%s2771_s1 + $0xd0] sm:$0xff]  ;;  %v184_v29 = vld [vmem:[%s2771_s1 + $0xe8] sm:$0xff]  ;;  %v183_v30 = vld [vmem:[%s2771_s1 + $0xe0] sm:$0xff] }
   0xb   :  { %v186_v31 = vld [vmem:[%s2771_s1 + $0xf8] sm:$0xff]  ;;  %v185_v32 = vld [vmem:[%s2771_s1 + $0xf0] sm:$0xff]  ;;  %v188_v33 = vld [vmem:[%s2771_s1 + $0x108] sm:$0xff] }
   0xc   :  { %v187_v34 = vld [vmem:[%s2771_s1 + $0x100] sm:$0xff]  ;;  %v190_v35 = vld [vmem:[%s2771_s1 + $0x118] sm:$0xff]  ;;  %v189_v36 = vld [vmem:[%s2771_s1 + $0x110] sm:$0xff] }
   0xd   :  { %v192_v37 = vld [vmem:[%s2771_s1 + $0x128] sm:$0xff]  ;;  %v191_v38 = vld [vmem:[%s2771_s1 + $0x120] sm:$0xff]  ;;  %v194_v39 = vld [vmem:[%s2771_s1 + $0x138] sm:$0xff] }
   0xe   :  { %336 = vperm.xlu1 %1314, %v162_v7   ;;  %331 = vperm.xlu0 %1313, %v161_v8   ;;  %v193_v40 = vld [vmem:[%s2771_s1 + $0x130] sm:$0xff]  ;;  %v196_v41 = vld [vmem:[%s2771_s1 + $0x148] sm:$0xff]  ;;  %v195_v42 = vld [vmem:[%s2771_s1 + $0x140] sm:$0xff] }
   0xf   :  { %v198_v43 = vld [vmem:[%s2771_s1 + $0x158] sm:$0xff]  ;;  %v197_v44 = vld [vmem:[%s2771_s1 + $0x150] sm:$0xff]  ;;  %v200_v45 = vld [vmem:[%s2771_s1 + $0x168] sm:$0xff] }
  0x10   :  { %v199_v46 = vld [vmem:[%s2771_s1 + $0x160] sm:$0xff]  ;;  %v202_v47 = vld [vmem:[%s2771_s1 + $0x178] sm:$0xff]  ;;  %v201_v48 = vld [vmem:[%s2771_s1 + $0x170] sm:$0xff] }
  0x11   :  { %v204_v49 = vld [vmem:[%s2771_s1 + $0x188] sm:$0xff]  ;;  %v203_v50 = vld [vmem:[%s2771_s1 + $0x180] sm:$0xff]  ;;  %v206_v51 = vld [vmem:[%s2771_s1 + $0x198] sm:$0xff] }
  0x12   :  { %346 = vperm.xlu1 %1314, %v164_v9   ;;  %341 = vperm.xlu0 %1313, %v163_v10   ;;  %v205_v52 = vld [vmem:[%s2771_s1 + $0x190] sm:$0xff]  ;;  %v208_v53 = vld [vmem:[%s2771_s1 + $0x1a8] sm:$0xff]  ;;  %v207_v54 = vld [vmem:[%s2771_s1 + $0x1a0] sm:$0xff] }
  0x13   :  { %v210_v55 = vld [vmem:[%s2771_s1 + $0x1b8] sm:$0xff]  ;;  %v209_v56 = vld [vmem:[%s2771_s1 + $0x1b0] sm:$0xff]  ;;  %v212_v57 = vld [vmem:[%s2771_s1 + $0x1c8] sm:$0xff] }
  0x14   :  { %v211_v58 = vld [vmem:[%s2771_s1 + $0x1c0] sm:$0xff]  ;;  %v214_v59 = vld [vmem:[%s2771_s1 + $0x1d8] sm:$0xff]  ;;  %v213_v60 = vld [vmem:[%s2771_s1 + $0x1d0] sm:$0xff] }
  0x15   :  { %v216_v61 = vld [vmem:[%s2771_s1 + $0x1e8] sm:$0xff]  ;;  %v215_v62 = vld [vmem:[%s2771_s1 + $0x1e0] sm:$0xff]  ;;  %v218_v63 = vld [vmem:[%s2771_s1 + $0x1f8] sm:$0xff] }
  0x16   :  { %356 = vperm.xlu1 %1314, %v166_v11   ;;  %351 = vperm.xlu0 %1313, %v165_v12   ;;  %v217_v0 = vld [vmem:[%s2771_s1 + $0x1f0] sm:$0xff]  ;;  %v11_v2 = vld [vmem:[%s2772_s0] sm:$0xff]  ;;  %v220_v3 = vld [vmem:[%s2771_s1 + $0x208] sm:$0xff] }
  0x17   :  { %v13_v1 = vld [vmem:[%s2772_s0 + $0x10] sm:$0xff]  ;;  %v219_v4 = vld [vmem:[%s2771_s1 + $0x200] sm:$0xff]  ;;  %v14_v9 = vld [vmem:[%s2772_s0 + $0x18] sm:$0xff] }
  0x18   :  { %v12_v10 = vld [vmem:[%s2772_s0 + $0x8] sm:$0xff]  ;;  %v222_v11 = vld [vmem:[%s2771_s1 + $0x218] sm:$0xff]  ;;  %v221_v12 = vld [vmem:[%s2771_s1 + $0x210] sm:$0xff] }
  0x1a   :  { %366 = vperm.xlu1 %1314, %v168_v13   ;;  %361 = vperm.xlu0 %1313, %v167_v14  }
  0x1e   :  { %376 = vperm.xlu1 %1314, %v170_v15   ;;  %371 = vperm.xlu0 %1313, %v169_v16  }
  0x22   :  { %386 = vperm.xlu1 %1314, %v172_v17   ;;  %381 = vperm.xlu0 %1313, %v171_v18  }
  0x26   :  { %396 = vperm.xlu1 %1314, %v174_v19   ;;  %391 = vperm.xlu0 %1313, %v173_v20   ;;  %v224_v19 = vld [vmem:[%s2771_s1 + $0x228] sm:$0xff]  ;;  %v223_v20 = vld [vmem:[%s2771_s1 + $0x220] sm:$0xff] }
  0x2a   :  { %406 = vperm.xlu1 %1314, %v176_v21   ;;  %401 = vperm.xlu0 %1313, %v175_v22  }
  0x2e   :  { %416 = vperm.xlu1 %1314, %v178_v23   ;;  %411 = vperm.xlu0 %1313, %v177_v24  }
  0x32   :  { %426 = vperm.xlu1 %1314, %v180_v25   ;;  %421 = vperm.xlu0 %1313, %v179_v26  }
  0x36   :  { %436 = vperm.xlu1 %1314, %v182_v27   ;;  %431 = vperm.xlu0 %1313, %v181_v28   ;;  %v226_v27 = vld [vmem:[%s2771_s1 + $0x238] sm:$0xff]  ;;  %v225_v28 = vld [vmem:[%s2771_s1 + $0x230] sm:$0xff] }
  0x3a   :  { %446 = vperm.xlu1 %1314, %v184_v29   ;;  %441 = vperm.xlu0 %1313, %v183_v30  }
  0x3e   :  { %456 = vperm.xlu1 %1314, %v186_v31   ;;  %451 = vperm.xlu0 %1313, %v185_v32  }
  0x42   :  { %466 = vperm.xlu1 %1314, %v188_v33   ;;  %461 = vperm.xlu0 %1313, %v187_v34  }
  0x46   :  { %476 = vperm.xlu1 %1314, %v190_v35   ;;  %471 = vperm.xlu0 %1313, %v189_v36   ;;  %v228_v35 = vld [vmem:[%s2771_s1 + $0x248] sm:$0xff]  ;;  %v227_v36 = vld [vmem:[%s2771_s1 + $0x240] sm:$0xff] }
  0x4a   :  { %486 = vperm.xlu1 %1314, %v192_v37   ;;  %481 = vperm.xlu0 %1313, %v191_v38  }
  0x4e   :  { %496 = vperm.xlu1 %1314, %v194_v39   ;;  %491 = vperm.xlu0 %1313, %v193_v40  }
  0x52   :  { %506 = vperm.xlu1 %1314, %v196_v41   ;;  %501 = vperm.xlu0 %1313, %v195_v42  }
  0x56   :  { %516 = vperm.xlu1 %1314, %v198_v43   ;;  %511 = vperm.xlu0 %1313, %v197_v44   ;;  %v230_v43 = vld [vmem:[%s2771_s1 + $0x258] sm:$0xff]  ;;  %v229_v44 = vld [vmem:[%s2771_s1 + $0x250] sm:$0xff] }
  0x5a   :  { %526 = vperm.xlu1 %1314, %v200_v45   ;;  %521 = vperm.xlu0 %1313, %v199_v46  }
  0x5e   :  { %536 = vperm.xlu1 %1314, %v202_v47   ;;  %531 = vperm.xlu0 %1313, %v201_v48  }
  0x62   :  { %546 = vperm.xlu1 %1314, %v204_v49   ;;  %541 = vperm.xlu0 %1313, %v203_v50  }
  0x66   :  { %556 = vperm.xlu1 %1314, %v206_v51   ;;  %551 = vperm.xlu0 %1313, %v205_v52   ;;  %v232_v51 = vld [vmem:[%s2771_s1 + $0x268] sm:$0xff]  ;;  %v231_v52 = vld [vmem:[%s2771_s1 + $0x260] sm:$0xff] }
  0x6a   :  { %566 = vperm.xlu1 %1314, %v208_v53   ;;  %561 = vperm.xlu0 %1313, %v207_v54  }
  0x6e   :  { %576 = vperm.xlu1 %1314, %v210_v55   ;;  %571 = vperm.xlu0 %1313, %v209_v56  }
  0x72   :  { %586 = vperm.xlu1 %1314, %v212_v57   ;;  %581 = vperm.xlu0 %1313, %v211_v58  }
  0x76   :  { %596 = vperm.xlu1 %1314, %v214_v59   ;;  %591 = vperm.xlu0 %1313, %v213_v60   ;;  %v234_v59 = vld [vmem:[%s2771_s1 + $0x278] sm:$0xff]  ;;  %v233_v60 = vld [vmem:[%s2771_s1 + $0x270] sm:$0xff] }
  0x7a   :  { %606 = vperm.xlu1 %1314, %v216_v61   ;;  %601 = vperm.xlu0 %1313, %v215_v62  }
  0x7e   :  { %616 = vperm.xlu1 %1314, %v218_v63   ;;  %611 = vperm.xlu0 %1313, %v217_v0  }
  0x81   :  { %v312_v5 = vpop.permute.xlu1 %311  ;;  %v302_v6 = vpop.permute.xlu0 %301 }
  0x82   :  { %v1021_v7 = vmul.f32 %v312_v5, %v13_v1  ;;  %v1019_v8 = vmul.f32 %v302_v6, %v11_v2  ;;  %626 = vperm.xlu1 %1314, %v220_v3   ;;  %621 = vperm.xlu0 %1313, %v219_v4   ;;  %v236_v3 = vld [vmem:[%s2771_s1 + $0x288] sm:$0xff]  ;;  %v235_v4 = vld [vmem:[%s2771_s1 + $0x280] sm:$0xff] }
  0x84   :  { %1166 = vst.msk [vmem:[%s2773_s2 + $0x10] sm:$0xff] %vm1163_vm0, %v1021_v7  ;;  %1164 = vst.msk [vmem:[%s2773_s2] sm:$0xff] %vm1163_vm0, %v1019_v8 }
  0x85   :  { %v317_v13 = vpop.permute.xlu1 %316  ;;  %v307_v14 = vpop.permute.xlu0 %306 }
  0x86   :  { %v1022_v15 = vmul.f32 %v317_v13, %v14_v9  ;;  %v1020_v16 = vmul.f32 %v307_v14, %v12_v10  ;;  %636 = vperm.xlu1 %1314, %v222_v11   ;;  %631 = vperm.xlu0 %1313, %v221_v12   ;;  %v238_v11 = vld [vmem:[%s2771_s1 + $0x298] sm:$0xff]  ;;  %v237_v12 = vld [vmem:[%s2771_s1 + $0x290] sm:$0xff] }
  0x89   :  { %v327_v21 = vpop.permute.xlu1 %326  ;;  %v322_v22 = vpop.permute.xlu0 %321 }
  0x8a   :  { %646 = vperm.xlu1 %1314, %v224_v19   ;;  %641 = vperm.xlu0 %1313, %v223_v20   ;;  %v240_v19 = vld [vmem:[%s2771_s1 + $0x2a8] sm:$0xff]  ;;  %v239_v20 = vld [vmem:[%s2771_s1 + $0x2a0] sm:$0xff] }
  0x8b   :  { %v16_v17 = vld [vmem:[%s2772_s0 + $0x28] sm:$0xff]  ;;  %v15_v18 = vld [vmem:[%s2772_s0 + $0x20] sm:$0xff] }
  0x8c   :  { %1167 = vst.msk [vmem:[%s2773_s2 + $0x18] sm:$0xff] %vm1163_vm0, %v1022_v15  ;;  %1165 = vst.msk [vmem:[%s2773_s2 + $0x8] sm:$0xff] %vm1163_vm0, %v1020_v16  ;;  %v1024_v23 = vmul.f32 %v327_v21, %v16_v17  ;;  %v1023_v24 = vmul.f32 %v322_v22, %v15_v18 }
  0x8d   :  { %v337_v29 = vpop.permute.xlu1 %336  ;;  %v332_v30 = vpop.permute.xlu0 %331 }
  0x8e   :  { %656 = vperm.xlu1 %1314, %v226_v27   ;;  %651 = vperm.xlu0 %1313, %v225_v28   ;;  %v242_v27 = vld [vmem:[%s2771_s1 + $0x2b8] sm:$0xff]  ;;  %v241_v28 = vld [vmem:[%s2771_s1 + $0x2b0] sm:$0xff] }
  0x91   :  { %v347_v37 = vpop.permute.xlu1 %346  ;;  %v342_v38 = vpop.permute.xlu0 %341 }
  0x92   :  { %666 = vperm.xlu1 %1314, %v228_v35   ;;  %661 = vperm.xlu0 %1313, %v227_v36   ;;  %v244_v35 = vld [vmem:[%s2771_s1 + $0x2c8] sm:$0xff]  ;;  %v243_v36 = vld [vmem:[%s2771_s1 + $0x2c0] sm:$0xff] }
  0x93   :  { %v18_v25 = vld [vmem:[%s2772_s0 + $0x38] sm:$0xff]  ;;  %v17_v26 = vld [vmem:[%s2772_s0 + $0x30] sm:$0xff] }
  0x94   :  { %1169 = vst.msk [vmem:[%s2773_s2 + $0x28] sm:$0xff] %vm1163_vm0, %v1024_v23  ;;  %1168 = vst.msk [vmem:[%s2773_s2 + $0x20] sm:$0xff] %vm1163_vm0, %v1023_v24  ;;  %v1026_v31 = vmul.f32 %v337_v29, %v18_v25  ;;  %v1025_v32 = vmul.f32 %v332_v30, %v17_v26 }
  0x95   :  { %v357_v45 = vpop.permute.xlu1 %356  ;;  %v352_v46 = vpop.permute.xlu0 %351 }
  0x96   :  { %676 = vperm.xlu1 %1314, %v230_v43   ;;  %671 = vperm.xlu0 %1313, %v229_v44   ;;  %v246_v43 = vld [vmem:[%s2771_s1 + $0x2d8] sm:$0xff]  ;;  %v245_v44 = vld [vmem:[%s2771_s1 + $0x2d0] sm:$0xff] }
  0x99   :  { %v367_v53 = vpop.permute.xlu1 %366  ;;  %v362_v54 = vpop.permute.xlu0 %361 }
  0x9a   :  { %686 = vperm.xlu1 %1314, %v232_v51   ;;  %681 = vperm.xlu0 %1313, %v231_v52   ;;  %v248_v51 = vld [vmem:[%s2771_s1 + $0x2e8] sm:$0xff]  ;;  %v247_v52 = vld [vmem:[%s2771_s1 + $0x2e0] sm:$0xff] }
  0x9b   :  { %v20_v33 = vld [vmem:[%s2772_s0 + $0x48] sm:$0xff]  ;;  %v19_v34 = vld [vmem:[%s2772_s0 + $0x40] sm:$0xff] }
  0x9c   :  { %1171 = vst.msk [vmem:[%s2773_s2 + $0x38] sm:$0xff] %vm1163_vm0, %v1026_v31  ;;  %1170 = vst.msk [vmem:[%s2773_s2 + $0x30] sm:$0xff] %vm1163_vm0, %v1025_v32  ;;  %v1028_v39 = vmul.f32 %v347_v37, %v20_v33  ;;  %v1027_v40 = vmul.f32 %v342_v38, %v19_v34 }
  0x9d   :  { %v377_v61 = vpop.permute.xlu1 %376  ;;  %v372_v62 = vpop.permute.xlu0 %371 }
  0x9e   :  { %696 = vperm.xlu1 %1314, %v234_v59   ;;  %691 = vperm.xlu0 %1313, %v233_v60   ;;  %v250_v59 = vld [vmem:[%s2771_s1 + $0x2f8] sm:$0xff]  ;;  %v249_v60 = vld [vmem:[%s2771_s1 + $0x2f0] sm:$0xff] }
  0xa1   :  { %v387_v5 = vpop.permute.xlu1 %386  ;;  %v382_v6 = vpop.permute.xlu0 %381 }
  0xa2   :  { %706 = vperm.xlu1 %1314, %v236_v3   ;;  %701 = vperm.xlu0 %1313, %v235_v4   ;;  %v252_v3 = vld [vmem:[%s2771_s1 + $0x308] sm:$0xff]  ;;  %v251_v4 = vld [vmem:[%s2771_s1 + $0x300] sm:$0xff] }
  0xa3   :  { %v22_v41 = vld [vmem:[%s2772_s0 + $0x58] sm:$0xff]  ;;  %v21_v42 = vld [vmem:[%s2772_s0 + $0x50] sm:$0xff] }
  0xa4   :  { %1173 = vst.msk [vmem:[%s2773_s2 + $0x48] sm:$0xff] %vm1163_vm0, %v1028_v39  ;;  %1172 = vst.msk [vmem:[%s2773_s2 + $0x40] sm:$0xff] %vm1163_vm0, %v1027_v40  ;;  %v1030_v47 = vmul.f32 %v357_v45, %v22_v41  ;;  %v1029_v48 = vmul.f32 %v352_v46, %v21_v42 }
  0xa5   :  { %v397_v13 = vpop.permute.xlu1 %396  ;;  %v392_v14 = vpop.permute.xlu0 %391 }
  0xa6   :  { %716 = vperm.xlu1 %1314, %v238_v11   ;;  %711 = vperm.xlu0 %1313, %v237_v12   ;;  %v254_v11 = vld [vmem:[%s2771_s1 + $0x318] sm:$0xff]  ;;  %v253_v12 = vld [vmem:[%s2771_s1 + $0x310] sm:$0xff] }
  0xa9   :  { %v407_v21 = vpop.permute.xlu1 %406  ;;  %v402_v22 = vpop.permute.xlu0 %401 }
  0xaa   :  { %726 = vperm.xlu1 %1314, %v240_v19   ;;  %721 = vperm.xlu0 %1313, %v239_v20   ;;  %v256_v19 = vld [vmem:[%s2771_s1 + $0x328] sm:$0xff]  ;;  %v255_v20 = vld [vmem:[%s2771_s1 + $0x320] sm:$0xff] }
  0xab   :  { %v24_v49 = vld [vmem:[%s2772_s0 + $0x68] sm:$0xff]  ;;  %v23_v50 = vld [vmem:[%s2772_s0 + $0x60] sm:$0xff] }
  0xac   :  { %1175 = vst.msk [vmem:[%s2773_s2 + $0x58] sm:$0xff] %vm1163_vm0, %v1030_v47  ;;  %1174 = vst.msk [vmem:[%s2773_s2 + $0x50] sm:$0xff] %vm1163_vm0, %v1029_v48  ;;  %v1032_v55 = vmul.f32 %v367_v53, %v24_v49  ;;  %v1031_v56 = vmul.f32 %v362_v54, %v23_v50 }
  0xad   :  { %v417_v29 = vpop.permute.xlu1 %416  ;;  %v412_v30 = vpop.permute.xlu0 %411 }
  0xae   :  { %736 = vperm.xlu1 %1314, %v242_v27   ;;  %731 = vperm.xlu0 %1313, %v241_v28   ;;  %v258_v27 = vld [vmem:[%s2771_s1 + $0x338] sm:$0xff]  ;;  %v257_v28 = vld [vmem:[%s2771_s1 + $0x330] sm:$0xff] }
  0xb1   :  { %v427_v37 = vpop.permute.xlu1 %426  ;;  %v422_v38 = vpop.permute.xlu0 %421 }
  0xb2   :  { %746 = vperm.xlu1 %1314, %v244_v35   ;;  %741 = vperm.xlu0 %1313, %v243_v36   ;;  %v260_v35 = vld [vmem:[%s2771_s1 + $0x348] sm:$0xff]  ;;  %v259_v36 = vld [vmem:[%s2771_s1 + $0x340] sm:$0xff] }
  0xb3   :  { %v26_v57 = vld [vmem:[%s2772_s0 + $0x78] sm:$0xff]  ;;  %v25_v58 = vld [vmem:[%s2772_s0 + $0x70] sm:$0xff] }
  0xb4   :  { %1177 = vst.msk [vmem:[%s2773_s2 + $0x68] sm:$0xff] %vm1163_vm0, %v1032_v55  ;;  %1176 = vst.msk [vmem:[%s2773_s2 + $0x60] sm:$0xff] %vm1163_vm0, %v1031_v56  ;;  %v1034_v63 = vmul.f32 %v377_v61, %v26_v57  ;;  %v1033_v0 = vmul.f32 %v372_v62, %v25_v58 }
  0xb5   :  { %v437_v45 = vpop.permute.xlu1 %436  ;;  %v432_v46 = vpop.permute.xlu0 %431 }
  0xb6   :  { %756 = vperm.xlu1 %1314, %v246_v43   ;;  %751 = vperm.xlu0 %1313, %v245_v44   ;;  %v262_v43 = vld [vmem:[%s2771_s1 + $0x358] sm:$0xff]  ;;  %v261_v44 = vld [vmem:[%s2771_s1 + $0x350] sm:$0xff] }
  0xb9   :  { %v447_v53 = vpop.permute.xlu1 %446  ;;  %v442_v54 = vpop.permute.xlu0 %441 }
  0xba   :  { %766 = vperm.xlu1 %1314, %v248_v51   ;;  %761 = vperm.xlu0 %1313, %v247_v52   ;;  %v264_v51 = vld [vmem:[%s2771_s1 + $0x368] sm:$0xff]  ;;  %v263_v52 = vld [vmem:[%s2771_s1 + $0x360] sm:$0xff] }
  0xbb   :  { %v28_v1 = vld [vmem:[%s2772_s0 + $0x88] sm:$0xff]  ;;  %v27_v2 = vld [vmem:[%s2772_s0 + $0x80] sm:$0xff] }
  0xbc   :  { %1179 = vst.msk [vmem:[%s2773_s2 + $0x78] sm:$0xff] %vm1163_vm0, %v1034_v63  ;;  %1178 = vst.msk [vmem:[%s2773_s2 + $0x70] sm:$0xff] %vm1163_vm0, %v1033_v0  ;;  %v1036_v7 = vmul.f32 %v387_v5, %v28_v1  ;;  %v1035_v8 = vmul.f32 %v382_v6, %v27_v2 }
  0xbd   :  { %v457_v61 = vpop.permute.xlu1 %456  ;;  %v452_v62 = vpop.permute.xlu0 %451 }
  0xbe   :  { %776 = vperm.xlu1 %1314, %v250_v59   ;;  %771 = vperm.xlu0 %1313, %v249_v60   ;;  %v266_v59 = vld [vmem:[%s2771_s1 + $0x378] sm:$0xff]  ;;  %v265_v60 = vld [vmem:[%s2771_s1 + $0x370] sm:$0xff] }
  0xc1   :  { %v467_v5 = vpop.permute.xlu1 %466  ;;  %v462_v6 = vpop.permute.xlu0 %461 }
  0xc2   :  { %786 = vperm.xlu1 %1314, %v252_v3   ;;  %781 = vperm.xlu0 %1313, %v251_v4   ;;  %v268_v3 = vld [vmem:[%s2771_s1 + $0x388] sm:$0xff]  ;;  %v267_v4 = vld [vmem:[%s2771_s1 + $0x380] sm:$0xff] }
  0xc3   :  { %v30_v9 = vld [vmem:[%s2772_s0 + $0x98] sm:$0xff]  ;;  %v29_v10 = vld [vmem:[%s2772_s0 + $0x90] sm:$0xff] }
  0xc4   :  { %1181 = vst.msk [vmem:[%s2773_s2 + $0x88] sm:$0xff] %vm1163_vm0, %v1036_v7  ;;  %1180 = vst.msk [vmem:[%s2773_s2 + $0x80] sm:$0xff] %vm1163_vm0, %v1035_v8  ;;  %v1038_v15 = vmul.f32 %v397_v13, %v30_v9  ;;  %v1037_v16 = vmul.f32 %v392_v14, %v29_v10 }
  0xc5   :  { %v477_v13 = vpop.permute.xlu1 %476  ;;  %v472_v14 = vpop.permute.xlu0 %471 }
  0xc6   :  { %796 = vperm.xlu1 %1314, %v254_v11   ;;  %791 = vperm.xlu0 %1313, %v253_v12   ;;  %v270_v11 = vld [vmem:[%s2771_s1 + $0x398] sm:$0xff]  ;;  %v269_v12 = vld [vmem:[%s2771_s1 + $0x390] sm:$0xff] }
  0xca   :  { %806 = vperm.xlu1 %1314, %v256_v19   ;;  %801 = vperm.xlu0 %1313, %v255_v20   ;;  %v272_v19 = vld [vmem:[%s2771_s1 + $0x3a8] sm:$0xff]  ;;  %v271_v20 = vld [vmem:[%s2771_s1 + $0x3a0] sm:$0xff] }
  0xcb   :  { %v32_v17 = vld [vmem:[%s2772_s0 + $0xa8] sm:$0xff]  ;;  %v31_v18 = vld [vmem:[%s2772_s0 + $0xa0] sm:$0xff] }
  0xcc   :  { %1183 = vst.msk [vmem:[%s2773_s2 + $0x98] sm:$0xff] %vm1163_vm0, %v1038_v15  ;;  %1182 = vst.msk [vmem:[%s2773_s2 + $0x90] sm:$0xff] %vm1163_vm0, %v1037_v16  ;;  %v1040_v23 = vmul.f32 %v407_v21, %v32_v17  ;;  %v1039_v24 = vmul.f32 %v402_v22, %v31_v18  ;;  %v487_v21 = vpop.permute.xlu1 %486  ;;  %v482_v22 = vpop.permute.xlu0 %481 }
  0xce   :  { %816 = vperm.xlu1 %1314, %v258_v27   ;;  %811 = vperm.xlu0 %1313, %v257_v28   ;;  %v274_v27 = vld [vmem:[%s2771_s1 + $0x3b8] sm:$0xff]  ;;  %v273_v28 = vld [vmem:[%s2771_s1 + $0x3b0] sm:$0xff] }
  0xd2   :  { %826 = vperm.xlu1 %1314, %v260_v35   ;;  %821 = vperm.xlu0 %1313, %v259_v36   ;;  %v276_v35 = vld [vmem:[%s2771_s1 + $0x3c8] sm:$0xff]  ;;  %v275_v36 = vld [vmem:[%s2771_s1 + $0x3c0] sm:$0xff] }
  0xd3   :  { %v34_v25 = vld [vmem:[%s2772_s0 + $0xb8] sm:$0xff]  ;;  %v33_v26 = vld [vmem:[%s2772_s0 + $0xb0] sm:$0xff] }
  0xd4   :  { %1185 = vst.msk [vmem:[%s2773_s2 + $0xa8] sm:$0xff] %vm1163_vm0, %v1040_v23  ;;  %1184 = vst.msk [vmem:[%s2773_s2 + $0xa0] sm:$0xff] %vm1163_vm0, %v1039_v24  ;;  %v1042_v31 = vmul.f32 %v417_v29, %v34_v25  ;;  %v1041_v32 = vmul.f32 %v412_v30, %v33_v26  ;;  %v497_v29 = vpop.permute.xlu1 %496  ;;  %v492_v30 = vpop.permute.xlu0 %491 }
  0xd6   :  { %836 = vperm.xlu1 %1314, %v262_v43   ;;  %831 = vperm.xlu0 %1313, %v261_v44   ;;  %v278_v43 = vld [vmem:[%s2771_s1 + $0x3d8] sm:$0xff]  ;;  %v277_v44 = vld [vmem:[%s2771_s1 + $0x3d0] sm:$0xff] }
  0xda   :  { %846 = vperm.xlu1 %1314, %v264_v51   ;;  %841 = vperm.xlu0 %1313, %v263_v52   ;;  %v280_v51 = vld [vmem:[%s2771_s1 + $0x3e8] sm:$0xff]  ;;  %v279_v52 = vld [vmem:[%s2771_s1 + $0x3e0] sm:$0xff] }
  0xdb   :  { %v36_v33 = vld [vmem:[%s2772_s0 + $0xc8] sm:$0xff]  ;;  %v35_v34 = vld [vmem:[%s2772_s0 + $0xc0] sm:$0xff] }
  0xdc   :  { %1187 = vst.msk [vmem:[%s2773_s2 + $0xb8] sm:$0xff] %vm1163_vm0, %v1042_v31  ;;  %1186 = vst.msk [vmem:[%s2773_s2 + $0xb0] sm:$0xff] %vm1163_vm0, %v1041_v32  ;;  %v1044_v39 = vmul.f32 %v427_v37, %v36_v33  ;;  %v1043_v40 = vmul.f32 %v422_v38, %v35_v34  ;;  %v507_v37 = vpop.permute.xlu1 %506  ;;  %v502_v38 = vpop.permute.xlu0 %501 }
  0xde   :  { %856 = vperm.xlu1 %1314, %v266_v59   ;;  %851 = vperm.xlu0 %1313, %v265_v60   ;;  %v282_v59 = vld [vmem:[%s2771_s1 + $0x3f8] sm:$0xff]  ;;  %v281_v60 = vld [vmem:[%s2771_s1 + $0x3f0] sm:$0xff] }
  0xe2   :  { %866 = vperm.xlu1 %1314, %v268_v3   ;;  %861 = vperm.xlu0 %1313, %v267_v4   ;;  %v284_v3 = vld [vmem:[%s2771_s1 + $0x408] sm:$0xff]  ;;  %v283_v4 = vld [vmem:[%s2771_s1 + $0x400] sm:$0xff] }
  0xe3   :  { %v38_v41 = vld [vmem:[%s2772_s0 + $0xd8] sm:$0xff]  ;;  %v37_v42 = vld [vmem:[%s2772_s0 + $0xd0] sm:$0xff] }
  0xe4   :  { %1189 = vst.msk [vmem:[%s2773_s2 + $0xc8] sm:$0xff] %vm1163_vm0, %v1044_v39  ;;  %1188 = vst.msk [vmem:[%s2773_s2 + $0xc0] sm:$0xff] %vm1163_vm0, %v1043_v40  ;;  %v1046_v47 = vmul.f32 %v437_v45, %v38_v41  ;;  %v1045_v48 = vmul.f32 %v432_v46, %v37_v42  ;;  %v517_v45 = vpop.permute.xlu1 %516  ;;  %v512_v46 = vpop.permute.xlu0 %511 }
  0xe6   :  { %876 = vperm.xlu1 %1314, %v270_v11   ;;  %871 = vperm.xlu0 %1313, %v269_v12   ;;  %v286_v11 = vld [vmem:[%s2771_s1 + $0x418] sm:$0xff]  ;;  %v285_v12 = vld [vmem:[%s2771_s1 + $0x410] sm:$0xff] }
  0xea   :  { %886 = vperm.xlu1 %1314, %v272_v19   ;;  %881 = vperm.xlu0 %1313, %v271_v20   ;;  %v288_v19 = vld [vmem:[%s2771_s1 + $0x428] sm:$0xff]  ;;  %v287_v20 = vld [vmem:[%s2771_s1 + $0x420] sm:$0xff] }
  0xeb   :  { %v40_v49 = vld [vmem:[%s2772_s0 + $0xe8] sm:$0xff]  ;;  %v39_v50 = vld [vmem:[%s2772_s0 + $0xe0] sm:$0xff] }
  0xec   :  { %1191 = vst.msk [vmem:[%s2773_s2 + $0xd8] sm:$0xff] %vm1163_vm0, %v1046_v47  ;;  %1190 = vst.msk [vmem:[%s2773_s2 + $0xd0] sm:$0xff] %vm1163_vm0, %v1045_v48  ;;  %v1048_v55 = vmul.f32 %v447_v53, %v40_v49  ;;  %v1047_v56 = vmul.f32 %v442_v54, %v39_v50  ;;  %v527_v53 = vpop.permute.xlu1 %526  ;;  %v522_v54 = vpop.permute.xlu0 %521 }
  0xee   :  { %896 = vperm.xlu1 %1314, %v274_v27   ;;  %891 = vperm.xlu0 %1313, %v273_v28   ;;  %v290_v27 = vld [vmem:[%s2771_s1 + $0x438] sm:$0xff]  ;;  %v289_v28 = vld [vmem:[%s2771_s1 + $0x430] sm:$0xff] }
  0xf2   :  { %906 = vperm.xlu1 %1314, %v276_v35   ;;  %901 = vperm.xlu0 %1313, %v275_v36   ;;  %v292_v35 = vld [vmem:[%s2771_s1 + $0x448] sm:$0xff]  ;;  %v291_v36 = vld [vmem:[%s2771_s1 + $0x440] sm:$0xff] }
  0xf3   :  { %v42_v57 = vld [vmem:[%s2772_s0 + $0xf8] sm:$0xff]  ;;  %v41_v58 = vld [vmem:[%s2772_s0 + $0xf0] sm:$0xff] }
  0xf4   :  { %1193 = vst.msk [vmem:[%s2773_s2 + $0xe8] sm:$0xff] %vm1163_vm0, %v1048_v55  ;;  %1192 = vst.msk [vmem:[%s2773_s2 + $0xe0] sm:$0xff] %vm1163_vm0, %v1047_v56  ;;  %v1050_v63 = vmul.f32 %v457_v61, %v42_v57  ;;  %v1049_v0 = vmul.f32 %v452_v62, %v41_v58  ;;  %v537_v61 = vpop.permute.xlu1 %536  ;;  %v532_v62 = vpop.permute.xlu0 %531 }
  0xf6   :  { %916 = vperm.xlu1 %1314, %v278_v43   ;;  %911 = vperm.xlu0 %1313, %v277_v44   ;;  %v294_v43 = vld [vmem:[%s2771_s1 + $0x458] sm:$0xff]  ;;  %v293_v44 = vld [vmem:[%s2771_s1 + $0x450] sm:$0xff] }
  0xfa   :  { %926 = vperm.xlu1 %1314, %v280_v51   ;;  %921 = vperm.xlu0 %1313, %v279_v52   ;;  %v296_v51 = vld [vmem:[%s2771_s1 + $0x468] sm:$0xff]  ;;  %v295_v52 = vld [vmem:[%s2771_s1 + $0x460] sm:$0xff] }
  0xfb   :  { %v44_v1 = vld [vmem:[%s2772_s0 + $0x108] sm:$0xff]  ;;  %v43_v2 = vld [vmem:[%s2772_s0 + $0x100] sm:$0xff] }
  0xfc   :  { %1195 = vst.msk [vmem:[%s2773_s2 + $0xf8] sm:$0xff] %vm1163_vm0, %v1050_v63  ;;  %1194 = vst.msk [vmem:[%s2773_s2 + $0xf0] sm:$0xff] %vm1163_vm0, %v1049_v0  ;;  %v1052_v7 = vmul.f32 %v467_v5, %v44_v1  ;;  %v1051_v8 = vmul.f32 %v462_v6, %v43_v2  ;;  %v547_v5 = vpop.permute.xlu1 %546  ;;  %v542_v6 = vpop.permute.xlu0 %541 }
  0xfe   :  { %936 = vperm.xlu1 %1314, %v282_v59   ;;  %931 = vperm.xlu0 %1313, %v281_v60   ;;  %v298_v59 = vld [vmem:[%s2771_s1 + $0x478] sm:$0xff]  ;;  %v297_v60 = vld [vmem:[%s2771_s1 + $0x470] sm:$0xff] }
 0x102   :  { %946 = vperm.xlu1 %1314, %v284_v3   ;;  %941 = vperm.xlu0 %1313, %v283_v4  }
 0x103   :  { %v46_v9 = vld [vmem:[%s2772_s0 + $0x118] sm:$0xff]  ;;  %v45_v10 = vld [vmem:[%s2772_s0 + $0x110] sm:$0xff] }
 0x104   :  { %1197 = vst.msk [vmem:[%s2773_s2 + $0x108] sm:$0xff] %vm1163_vm0, %v1052_v7  ;;  %1196 = vst.msk [vmem:[%s2773_s2 + $0x100] sm:$0xff] %vm1163_vm0, %v1051_v8  ;;  %v1054_v15 = vmul.f32 %v477_v13, %v46_v9  ;;  %v1053_v16 = vmul.f32 %v472_v14, %v45_v10  ;;  %v557_v13 = vpop.permute.xlu1 %556  ;;  %v552_v14 = vpop.permute.xlu0 %551 }
 0x106   :  { %956 = vperm.xlu1 %1314, %v286_v11   ;;  %951 = vperm.xlu0 %1313, %v285_v12  }
 0x10a   :  { %966 = vperm.xlu1 %1314, %v288_v19   ;;  %961 = vperm.xlu0 %1313, %v287_v20  }
 0x10b   :  { %v48_v17 = vld [vmem:[%s2772_s0 + $0x128] sm:$0xff]  ;;  %v47_v18 = vld [vmem:[%s2772_s0 + $0x120] sm:$0xff] }
 0x10c   :  { %1199 = vst.msk [vmem:[%s2773_s2 + $0x118] sm:$0xff] %vm1163_vm0, %v1054_v15  ;;  %1198 = vst.msk [vmem:[%s2773_s2 + $0x110] sm:$0xff] %vm1163_vm0, %v1053_v16  ;;  %v1056_v23 = vmul.f32 %v487_v21, %v48_v17  ;;  %v1055_v24 = vmul.f32 %v482_v22, %v47_v18  ;;  %v567_v21 = vpop.permute.xlu1 %566  ;;  %v562_v22 = vpop.permute.xlu0 %561 }
 0x10e   :  { %976 = vperm.xlu1 %1314, %v290_v27   ;;  %971 = vperm.xlu0 %1313, %v289_v28  }
 0x112   :  { %986 = vperm.xlu1 %1314, %v292_v35   ;;  %981 = vperm.xlu0 %1313, %v291_v36  }
 0x113   :  { %v50_v25 = vld [vmem:[%s2772_s0 + $0x138] sm:$0xff]  ;;  %v49_v26 = vld [vmem:[%s2772_s0 + $0x130] sm:$0xff] }
 0x114   :  { %1201 = vst.msk [vmem:[%s2773_s2 + $0x128] sm:$0xff] %vm1163_vm0, %v1056_v23  ;;  %1200 = vst.msk [vmem:[%s2773_s2 + $0x120] sm:$0xff] %vm1163_vm0, %v1055_v24  ;;  %v1058_v31 = vmul.f32 %v497_v29, %v50_v25  ;;  %v1057_v32 = vmul.f32 %v492_v30, %v49_v26  ;;  %v577_v29 = vpop.permute.xlu1 %576  ;;  %v572_v30 = vpop.permute.xlu0 %571 }
 0x116   :  { %996 = vperm.xlu1 %1314, %v294_v43   ;;  %991 = vperm.xlu0 %1313, %v293_v44  }
 0x11a   :  { %1006 = vperm.xlu1 %1314, %v296_v51   ;;  %1001 = vperm.xlu0 %1313, %v295_v52  }
 0x11b   :  { %v52_v33 = vld [vmem:[%s2772_s0 + $0x148] sm:$0xff]  ;;  %v51_v34 = vld [vmem:[%s2772_s0 + $0x140] sm:$0xff] }
 0x11c   :  { %1203 = vst.msk [vmem:[%s2773_s2 + $0x138] sm:$0xff] %vm1163_vm0, %v1058_v31  ;;  %1202 = vst.msk [vmem:[%s2773_s2 + $0x130] sm:$0xff] %vm1163_vm0, %v1057_v32  ;;  %v1060_v39 = vmul.f32 %v507_v37, %v52_v33  ;;  %v1059_v40 = vmul.f32 %v502_v38, %v51_v34  ;;  %v587_v37 = vpop.permute.xlu1 %586  ;;  %v582_v38 = vpop.permute.xlu0 %581 }
 0x11e   :  { %1016 = vperm.xlu1 %1314, %v298_v59   ;;  %1011 = vperm.xlu0 %1313, %v297_v60  }
 0x123   :  { %v54_v41 = vld [vmem:[%s2772_s0 + $0x158] sm:$0xff]  ;;  %v53_v42 = vld [vmem:[%s2772_s0 + $0x150] sm:$0xff] }
 0x124   :  { %1205 = vst.msk [vmem:[%s2773_s2 + $0x148] sm:$0xff] %vm1163_vm0, %v1060_v39  ;;  %1204 = vst.msk [vmem:[%s2773_s2 + $0x140] sm:$0xff] %vm1163_vm0, %v1059_v40  ;;  %v1062_v47 = vmul.f32 %v517_v45, %v54_v41  ;;  %v1061_v48 = vmul.f32 %v512_v46, %v53_v42  ;;  %v597_v45 = vpop.permute.xlu1 %596  ;;  %v592_v46 = vpop.permute.xlu0 %591 }
 0x12b   :  { %v56_v49 = vld [vmem:[%s2772_s0 + $0x168] sm:$0xff]  ;;  %v55_v50 = vld [vmem:[%s2772_s0 + $0x160] sm:$0xff] }
 0x12c   :  { %1207 = vst.msk [vmem:[%s2773_s2 + $0x158] sm:$0xff] %vm1163_vm0, %v1062_v47  ;;  %1206 = vst.msk [vmem:[%s2773_s2 + $0x150] sm:$0xff] %vm1163_vm0, %v1061_v48  ;;  %v1064_v55 = vmul.f32 %v527_v53, %v56_v49  ;;  %v1063_v56 = vmul.f32 %v522_v54, %v55_v50  ;;  %v607_v53 = vpop.permute.xlu1 %606  ;;  %v602_v54 = vpop.permute.xlu0 %601 }
 0x133   :  { %v58_v57 = vld [vmem:[%s2772_s0 + $0x178] sm:$0xff]  ;;  %v57_v58 = vld [vmem:[%s2772_s0 + $0x170] sm:$0xff] }
 0x134   :  { %1209 = vst.msk [vmem:[%s2773_s2 + $0x168] sm:$0xff] %vm1163_vm0, %v1064_v55  ;;  %1208 = vst.msk [vmem:[%s2773_s2 + $0x160] sm:$0xff] %vm1163_vm0, %v1063_v56  ;;  %v1066_v63 = vmul.f32 %v537_v61, %v58_v57  ;;  %v1065_v0 = vmul.f32 %v532_v62, %v57_v58  ;;  %v617_v61 = vpop.permute.xlu1 %616  ;;  %v612_v62 = vpop.permute.xlu0 %611 }
 0x13b   :  { %v60_v1 = vld [vmem:[%s2772_s0 + $0x188] sm:$0xff]  ;;  %v59_v2 = vld [vmem:[%s2772_s0 + $0x180] sm:$0xff] }
 0x13c   :  { %1211 = vst.msk [vmem:[%s2773_s2 + $0x178] sm:$0xff] %vm1163_vm0, %v1066_v63  ;;  %1210 = vst.msk [vmem:[%s2773_s2 + $0x170] sm:$0xff] %vm1163_vm0, %v1065_v0  ;;  %v1068_v7 = vmul.f32 %v547_v5, %v60_v1  ;;  %v1067_v8 = vmul.f32 %v542_v6, %v59_v2  ;;  %v627_v5 = vpop.permute.xlu1 %626  ;;  %v622_v6 = vpop.permute.xlu0 %621 }
 0x143   :  { %v62_v9 = vld [vmem:[%s2772_s0 + $0x198] sm:$0xff]  ;;  %v61_v10 = vld [vmem:[%s2772_s0 + $0x190] sm:$0xff] }
 0x144   :  { %1213 = vst.msk [vmem:[%s2773_s2 + $0x188] sm:$0xff] %vm1163_vm0, %v1068_v7  ;;  %1212 = vst.msk [vmem:[%s2773_s2 + $0x180] sm:$0xff] %vm1163_vm0, %v1067_v8  ;;  %v1070_v15 = vmul.f32 %v557_v13, %v62_v9  ;;  %v1069_v16 = vmul.f32 %v552_v14, %v61_v10  ;;  %v637_v13 = vpop.permute.xlu1 %636  ;;  %v632_v14 = vpop.permute.xlu0 %631 }
 0x14b   :  { %v64_v17 = vld [vmem:[%s2772_s0 + $0x1a8] sm:$0xff]  ;;  %v63_v18 = vld [vmem:[%s2772_s0 + $0x1a0] sm:$0xff] }
 0x14c   :  { %1215 = vst.msk [vmem:[%s2773_s2 + $0x198] sm:$0xff] %vm1163_vm0, %v1070_v15  ;;  %1214 = vst.msk [vmem:[%s2773_s2 + $0x190] sm:$0xff] %vm1163_vm0, %v1069_v16  ;;  %v1072_v23 = vmul.f32 %v567_v21, %v64_v17  ;;  %v1071_v24 = vmul.f32 %v562_v22, %v63_v18  ;;  %v647_v21 = vpop.permute.xlu1 %646  ;;  %v642_v22 = vpop.permute.xlu0 %641 }
 0x153   :  { %v66_v25 = vld [vmem:[%s2772_s0 + $0x1b8] sm:$0xff]  ;;  %v65_v26 = vld [vmem:[%s2772_s0 + $0x1b0] sm:$0xff] }
 0x154   :  { %1217 = vst.msk [vmem:[%s2773_s2 + $0x1a8] sm:$0xff] %vm1163_vm0, %v1072_v23  ;;  %1216 = vst.msk [vmem:[%s2773_s2 + $0x1a0] sm:$0xff] %vm1163_vm0, %v1071_v24  ;;  %v1074_v31 = vmul.f32 %v577_v29, %v66_v25  ;;  %v1073_v32 = vmul.f32 %v572_v30, %v65_v26  ;;  %v657_v29 = vpop.permute.xlu1 %656  ;;  %v652_v30 = vpop.permute.xlu0 %651 }
 0x15b   :  { %v68_v33 = vld [vmem:[%s2772_s0 + $0x1c8] sm:$0xff]  ;;  %v67_v34 = vld [vmem:[%s2772_s0 + $0x1c0] sm:$0xff] }
 0x15c   :  { %1219 = vst.msk [vmem:[%s2773_s2 + $0x1b8] sm:$0xff] %vm1163_vm0, %v1074_v31  ;;  %1218 = vst.msk [vmem:[%s2773_s2 + $0x1b0] sm:$0xff] %vm1163_vm0, %v1073_v32  ;;  %v1076_v39 = vmul.f32 %v587_v37, %v68_v33  ;;  %v1075_v40 = vmul.f32 %v582_v38, %v67_v34  ;;  %v667_v37 = vpop.permute.xlu1 %666  ;;  %v662_v38 = vpop.permute.xlu0 %661 }
 0x163   :  { %v70_v41 = vld [vmem:[%s2772_s0 + $0x1d8] sm:$0xff]  ;;  %v69_v42 = vld [vmem:[%s2772_s0 + $0x1d0] sm:$0xff] }
 0x164   :  { %1221 = vst.msk [vmem:[%s2773_s2 + $0x1c8] sm:$0xff] %vm1163_vm0, %v1076_v39  ;;  %1220 = vst.msk [vmem:[%s2773_s2 + $0x1c0] sm:$0xff] %vm1163_vm0, %v1075_v40  ;;  %v1078_v47 = vmul.f32 %v597_v45, %v70_v41  ;;  %v1077_v48 = vmul.f32 %v592_v46, %v69_v42  ;;  %v677_v45 = vpop.permute.xlu1 %676  ;;  %v672_v46 = vpop.permute.xlu0 %671 }
 0x16b   :  { %v72_v49 = vld [vmem:[%s2772_s0 + $0x1e8] sm:$0xff]  ;;  %v71_v50 = vld [vmem:[%s2772_s0 + $0x1e0] sm:$0xff] }
 0x16c   :  { %1223 = vst.msk [vmem:[%s2773_s2 + $0x1d8] sm:$0xff] %vm1163_vm0, %v1078_v47  ;;  %1222 = vst.msk [vmem:[%s2773_s2 + $0x1d0] sm:$0xff] %vm1163_vm0, %v1077_v48  ;;  %v1080_v55 = vmul.f32 %v607_v53, %v72_v49  ;;  %v1079_v56 = vmul.f32 %v602_v54, %v71_v50  ;;  %v687_v53 = vpop.permute.xlu1 %686  ;;  %v682_v54 = vpop.permute.xlu0 %681 }
 0x173   :  { %v74_v57 = vld [vmem:[%s2772_s0 + $0x1f8] sm:$0xff]  ;;  %v73_v58 = vld [vmem:[%s2772_s0 + $0x1f0] sm:$0xff] }
 0x174   :  { %1225 = vst.msk [vmem:[%s2773_s2 + $0x1e8] sm:$0xff] %vm1163_vm0, %v1080_v55  ;;  %1224 = vst.msk [vmem:[%s2773_s2 + $0x1e0] sm:$0xff] %vm1163_vm0, %v1079_v56  ;;  %v1082_v63 = vmul.f32 %v617_v61, %v74_v57  ;;  %v1081_v0 = vmul.f32 %v612_v62, %v73_v58  ;;  %v697_v61 = vpop.permute.xlu1 %696  ;;  %v692_v62 = vpop.permute.xlu0 %691 }
 0x178   :  { %v707_v3 = vpop.permute.xlu1 %706  ;;  %v702_v4 = vpop.permute.xlu0 %701 }
 0x17b   :  { %v76_v1 = vld [vmem:[%s2772_s0 + $0x208] sm:$0xff]  ;;  %v75_v2 = vld [vmem:[%s2772_s0 + $0x200] sm:$0xff] }
 0x17c   :  { %1227 = vst.msk [vmem:[%s2773_s2 + $0x1f8] sm:$0xff] %vm1163_vm0, %v1082_v63  ;;  %1226 = vst.msk [vmem:[%s2773_s2 + $0x1f0] sm:$0xff] %vm1163_vm0, %v1081_v0  ;;  %v1084_v7 = vmul.f32 %v627_v5, %v76_v1  ;;  %v1083_v8 = vmul.f32 %v622_v6, %v75_v2 }
 0x183   :  { %v78_v9 = vld [vmem:[%s2772_s0 + $0x218] sm:$0xff]  ;;  %v77_v10 = vld [vmem:[%s2772_s0 + $0x210] sm:$0xff] }
 0x184   :  { %1229 = vst.msk [vmem:[%s2773_s2 + $0x208] sm:$0xff] %vm1163_vm0, %v1084_v7  ;;  %1228 = vst.msk [vmem:[%s2773_s2 + $0x200] sm:$0xff] %vm1163_vm0, %v1083_v8  ;;  %v1086_v15 = vmul.f32 %v637_v13, %v78_v9  ;;  %v1085_v16 = vmul.f32 %v632_v14, %v77_v10  ;;  %v717_v9 = vpop.permute.xlu1 %716  ;;  %v712_v10 = vpop.permute.xlu0 %711 }
 0x18b   :  { %v80_v17 = vld [vmem:[%s2772_s0 + $0x228] sm:$0xff]  ;;  %v79_v18 = vld [vmem:[%s2772_s0 + $0x220] sm:$0xff] }
 0x18c   :  { %1231 = vst.msk [vmem:[%s2773_s2 + $0x218] sm:$0xff] %vm1163_vm0, %v1086_v15  ;;  %1230 = vst.msk [vmem:[%s2773_s2 + $0x210] sm:$0xff] %vm1163_vm0, %v1085_v16  ;;  %v1088_v23 = vmul.f32 %v647_v21, %v80_v17  ;;  %v1087_v24 = vmul.f32 %v642_v22, %v79_v18  ;;  %v727_v15 = vpop.permute.xlu1 %726  ;;  %v722_v16 = vpop.permute.xlu0 %721 }
 0x190   :  { %v737_v21 = vpop.permute.xlu1 %736  ;;  %v732_v22 = vpop.permute.xlu0 %731 }
 0x193   :  { %v82_v25 = vld [vmem:[%s2772_s0 + $0x238] sm:$0xff]  ;;  %v81_v26 = vld [vmem:[%s2772_s0 + $0x230] sm:$0xff] }
 0x194   :  { %1233 = vst.msk [vmem:[%s2773_s2 + $0x228] sm:$0xff] %vm1163_vm0, %v1088_v23  ;;  %1232 = vst.msk [vmem:[%s2773_s2 + $0x220] sm:$0xff] %vm1163_vm0, %v1087_v24  ;;  %v1090_v31 = vmul.f32 %v657_v29, %v82_v25  ;;  %v1089_v32 = vmul.f32 %v652_v30, %v81_v26  ;;  %v747_v27 = vpop.permute.xlu1 %746  ;;  %v742_v28 = vpop.permute.xlu0 %741 }
 0x19b   :  { %v84_v33 = vld [vmem:[%s2772_s0 + $0x248] sm:$0xff]  ;;  %v83_v34 = vld [vmem:[%s2772_s0 + $0x240] sm:$0xff] }
 0x19c   :  { %1235 = vst.msk [vmem:[%s2773_s2 + $0x238] sm:$0xff] %vm1163_vm0, %v1090_v31  ;;  %1234 = vst.msk [vmem:[%s2773_s2 + $0x230] sm:$0xff] %vm1163_vm0, %v1089_v32  ;;  %v1092_v39 = vmul.f32 %v667_v37, %v84_v33  ;;  %v1091_v40 = vmul.f32 %v662_v38, %v83_v34  ;;  %v757_v33 = vpop.permute.xlu1 %756  ;;  %v752_v34 = vpop.permute.xlu0 %751 }
 0x1a3   :  { %v86_v41 = vld [vmem:[%s2772_s0 + $0x258] sm:$0xff]  ;;  %v85_v42 = vld [vmem:[%s2772_s0 + $0x250] sm:$0xff] }
 0x1a4   :  { %1237 = vst.msk [vmem:[%s2773_s2 + $0x248] sm:$0xff] %vm1163_vm0, %v1092_v39  ;;  %1236 = vst.msk [vmem:[%s2773_s2 + $0x240] sm:$0xff] %vm1163_vm0, %v1091_v40  ;;  %v1094_v47 = vmul.f32 %v677_v45, %v86_v41  ;;  %v1093_v48 = vmul.f32 %v672_v46, %v85_v42  ;;  %v767_v39 = vpop.permute.xlu1 %766  ;;  %v762_v40 = vpop.permute.xlu0 %761 }
 0x1a8   :  { %v777_v45 = vpop.permute.xlu1 %776  ;;  %v772_v46 = vpop.permute.xlu0 %771 }
 0x1ab   :  { %v88_v49 = vld [vmem:[%s2772_s0 + $0x268] sm:$0xff]  ;;  %v87_v50 = vld [vmem:[%s2772_s0 + $0x260] sm:$0xff] }
 0x1ac   :  { %1239 = vst.msk [vmem:[%s2773_s2 + $0x258] sm:$0xff] %vm1163_vm0, %v1094_v47  ;;  %1238 = vst.msk [vmem:[%s2773_s2 + $0x250] sm:$0xff] %vm1163_vm0, %v1093_v48  ;;  %v1096_v55 = vmul.f32 %v687_v53, %v88_v49  ;;  %v1095_v56 = vmul.f32 %v682_v54, %v87_v50  ;;  %v787_v51 = vpop.permute.xlu1 %786  ;;  %v782_v52 = vpop.permute.xlu0 %781 }
 0x1b3   :  { %v90_v57 = vld [vmem:[%s2772_s0 + $0x278] sm:$0xff]  ;;  %v89_v58 = vld [vmem:[%s2772_s0 + $0x270] sm:$0xff] }
 0x1b4   :  { %1241 = vst.msk [vmem:[%s2773_s2 + $0x268] sm:$0xff] %vm1163_vm0, %v1096_v55  ;;  %1240 = vst.msk [vmem:[%s2773_s2 + $0x260] sm:$0xff] %vm1163_vm0, %v1095_v56  ;;  %v1098_v63 = vmul.f32 %v697_v61, %v90_v57  ;;  %v1097_v0 = vmul.f32 %v692_v62, %v89_v58  ;;  %v797_v57 = vpop.permute.xlu1 %796  ;;  %v792_v58 = vpop.permute.xlu0 %791 }
 0x1bb   :  { %v92_v1 = vld [vmem:[%s2772_s0 + $0x288] sm:$0xff]  ;;  %v91_v2 = vld [vmem:[%s2772_s0 + $0x280] sm:$0xff] }
 0x1bc   :  { %1243 = vst.msk [vmem:[%s2773_s2 + $0x278] sm:$0xff] %vm1163_vm0, %v1098_v63  ;;  %1242 = vst.msk [vmem:[%s2773_s2 + $0x270] sm:$0xff] %vm1163_vm0, %v1097_v0  ;;  %v1100_v5 = vmul.f32 %v707_v3, %v92_v1  ;;  %v1099_v6 = vmul.f32 %v702_v4, %v91_v2  ;;  %v807_v63 = vpop.permute.xlu1 %806  ;;  %v802_v0 = vpop.permute.xlu0 %801 }
 0x1c3   :  { %v94_v7 = vld [vmem:[%s2772_s0 + $0x298] sm:$0xff]  ;;  %v93_v8 = vld [vmem:[%s2772_s0 + $0x290] sm:$0xff] }
 0x1c4   :  { %1245 = vst.msk [vmem:[%s2773_s2 + $0x288] sm:$0xff] %vm1163_vm0, %v1100_v5  ;;  %1244 = vst.msk [vmem:[%s2773_s2 + $0x280] sm:$0xff] %vm1163_vm0, %v1099_v6  ;;  %v1102_v11 = vmul.f32 %v717_v9, %v94_v7  ;;  %v1101_v12 = vmul.f32 %v712_v10, %v93_v8  ;;  %v817_v5 = vpop.permute.xlu1 %816  ;;  %v812_v6 = vpop.permute.xlu0 %811 }
 0x1cb   :  { %v96_v13 = vld [vmem:[%s2772_s0 + $0x2a8] sm:$0xff]  ;;  %v95_v14 = vld [vmem:[%s2772_s0 + $0x2a0] sm:$0xff] }
 0x1cc   :  { %1247 = vst.msk [vmem:[%s2773_s2 + $0x298] sm:$0xff] %vm1163_vm0, %v1102_v11  ;;  %1246 = vst.msk [vmem:[%s2773_s2 + $0x290] sm:$0xff] %vm1163_vm0, %v1101_v12  ;;  %v1104_v17 = vmul.f32 %v727_v15, %v96_v13  ;;  %v1103_v18 = vmul.f32 %v722_v16, %v95_v14  ;;  %v827_v11 = vpop.permute.xlu1 %826  ;;  %v822_v12 = vpop.permute.xlu0 %821 }
 0x1d3   :  { %v98_v19 = vld [vmem:[%s2772_s0 + $0x2b8] sm:$0xff]  ;;  %v97_v20 = vld [vmem:[%s2772_s0 + $0x2b0] sm:$0xff] }
 0x1d4   :  { %1249 = vst.msk [vmem:[%s2773_s2 + $0x2a8] sm:$0xff] %vm1163_vm0, %v1104_v17  ;;  %1248 = vst.msk [vmem:[%s2773_s2 + $0x2a0] sm:$0xff] %vm1163_vm0, %v1103_v18  ;;  %v1106_v23 = vmul.f32 %v737_v21, %v98_v19  ;;  %v1105_v24 = vmul.f32 %v732_v22, %v97_v20  ;;  %v837_v17 = vpop.permute.xlu1 %836  ;;  %v832_v18 = vpop.permute.xlu0 %831 }
 0x1db   :  { %v100_v25 = vld [vmem:[%s2772_s0 + $0x2c8] sm:$0xff]  ;;  %v99_v26 = vld [vmem:[%s2772_s0 + $0x2c0] sm:$0xff] }
 0x1dc   :  { %1251 = vst.msk [vmem:[%s2773_s2 + $0x2b8] sm:$0xff] %vm1163_vm0, %v1106_v23  ;;  %1250 = vst.msk [vmem:[%s2773_s2 + $0x2b0] sm:$0xff] %vm1163_vm0, %v1105_v24  ;;  %v1108_v29 = vmul.f32 %v747_v27, %v100_v25  ;;  %v1107_v30 = vmul.f32 %v742_v28, %v99_v26  ;;  %v847_v23 = vpop.permute.xlu1 %846  ;;  %v842_v24 = vpop.permute.xlu0 %841 }
 0x1e3   :  { %v102_v31 = vld [vmem:[%s2772_s0 + $0x2d8] sm:$0xff]  ;;  %v101_v32 = vld [vmem:[%s2772_s0 + $0x2d0] sm:$0xff] }
 0x1e4   :  { %1253 = vst.msk [vmem:[%s2773_s2 + $0x2c8] sm:$0xff] %vm1163_vm0, %v1108_v29  ;;  %1252 = vst.msk [vmem:[%s2773_s2 + $0x2c0] sm:$0xff] %vm1163_vm0, %v1107_v30  ;;  %v1110_v35 = vmul.f32 %v757_v33, %v102_v31  ;;  %v1109_v36 = vmul.f32 %v752_v34, %v101_v32  ;;  %v857_v29 = vpop.permute.xlu1 %856  ;;  %v852_v30 = vpop.permute.xlu0 %851 }
 0x1eb   :  { %v104_v37 = vld [vmem:[%s2772_s0 + $0x2e8] sm:$0xff]  ;;  %v103_v38 = vld [vmem:[%s2772_s0 + $0x2e0] sm:$0xff] }
 0x1ec   :  { %1255 = vst.msk [vmem:[%s2773_s2 + $0x2d8] sm:$0xff] %vm1163_vm0, %v1110_v35  ;;  %1254 = vst.msk [vmem:[%s2773_s2 + $0x2d0] sm:$0xff] %vm1163_vm0, %v1109_v36  ;;  %v1112_v41 = vmul.f32 %v767_v39, %v104_v37  ;;  %v1111_v42 = vmul.f32 %v762_v40, %v103_v38  ;;  %v867_v35 = vpop.permute.xlu1 %866  ;;  %v862_v36 = vpop.permute.xlu0 %861 }
 0x1f3   :  { %v106_v43 = vld [vmem:[%s2772_s0 + $0x2f8] sm:$0xff]  ;;  %v105_v44 = vld [vmem:[%s2772_s0 + $0x2f0] sm:$0xff] }
 0x1f4   :  { %1257 = vst.msk [vmem:[%s2773_s2 + $0x2e8] sm:$0xff] %vm1163_vm0, %v1112_v41  ;;  %1256 = vst.msk [vmem:[%s2773_s2 + $0x2e0] sm:$0xff] %vm1163_vm0, %v1111_v42  ;;  %v1114_v47 = vmul.f32 %v777_v45, %v106_v43  ;;  %v1113_v48 = vmul.f32 %v772_v46, %v105_v44  ;;  %v877_v41 = vpop.permute.xlu1 %876  ;;  %v872_v42 = vpop.permute.xlu0 %871 }
 0x1fb   :  { %v108_v49 = vld [vmem:[%s2772_s0 + $0x308] sm:$0xff]  ;;  %v107_v50 = vld [vmem:[%s2772_s0 + $0x300] sm:$0xff] }
 0x1fc   :  { %1259 = vst.msk [vmem:[%s2773_s2 + $0x2f8] sm:$0xff] %vm1163_vm0, %v1114_v47  ;;  %1258 = vst.msk [vmem:[%s2773_s2 + $0x2f0] sm:$0xff] %vm1163_vm0, %v1113_v48  ;;  %v1116_v53 = vmul.f32 %v787_v51, %v108_v49  ;;  %v1115_v54 = vmul.f32 %v782_v52, %v107_v50  ;;  %v887_v47 = vpop.permute.xlu1 %886  ;;  %v882_v48 = vpop.permute.xlu0 %881 }
 0x203   :  { %v110_v55 = vld [vmem:[%s2772_s0 + $0x318] sm:$0xff]  ;;  %v109_v56 = vld [vmem:[%s2772_s0 + $0x310] sm:$0xff] }
 0x204   :  { %1261 = vst.msk [vmem:[%s2773_s2 + $0x308] sm:$0xff] %vm1163_vm0, %v1116_v53  ;;  %1260 = vst.msk [vmem:[%s2773_s2 + $0x300] sm:$0xff] %vm1163_vm0, %v1115_v54  ;;  %v1118_v59 = vmul.f32 %v797_v57, %v110_v55  ;;  %v1117_v60 = vmul.f32 %v792_v58, %v109_v56  ;;  %v897_v53 = vpop.permute.xlu1 %896  ;;  %v892_v54 = vpop.permute.xlu0 %891 }
 0x20b   :  { %v112_v61 = vld [vmem:[%s2772_s0 + $0x328] sm:$0xff]  ;;  %v111_v62 = vld [vmem:[%s2772_s0 + $0x320] sm:$0xff] }
 0x20c   :  { %1263 = vst.msk [vmem:[%s2773_s2 + $0x318] sm:$0xff] %vm1163_vm0, %v1118_v59  ;;  %1262 = vst.msk [vmem:[%s2773_s2 + $0x310] sm:$0xff] %vm1163_vm0, %v1117_v60  ;;  %v1120_v1 = vmul.f32 %v807_v63, %v112_v61  ;;  %v1119_v2 = vmul.f32 %v802_v0, %v111_v62  ;;  %v907_v59 = vpop.permute.xlu1 %906  ;;  %v902_v60 = vpop.permute.xlu0 %901 }
 0x213   :  { %v114_v3 = vld [vmem:[%s2772_s0 + $0x338] sm:$0xff]  ;;  %v113_v4 = vld [vmem:[%s2772_s0 + $0x330] sm:$0xff] }
 0x214   :  { %1265 = vst.msk [vmem:[%s2773_s2 + $0x328] sm:$0xff] %vm1163_vm0, %v1120_v1  ;;  %1264 = vst.msk [vmem:[%s2773_s2 + $0x320] sm:$0xff] %vm1163_vm0, %v1119_v2  ;;  %v1122_v7 = vmul.f32 %v817_v5, %v114_v3  ;;  %v1121_v8 = vmul.f32 %v812_v6, %v113_v4  ;;  %v917_v1 = vpop.permute.xlu1 %916  ;;  %v912_v2 = vpop.permute.xlu0 %911 }
 0x21b   :  { %v116_v9 = vld [vmem:[%s2772_s0 + $0x348] sm:$0xff]  ;;  %v115_v10 = vld [vmem:[%s2772_s0 + $0x340] sm:$0xff] }
 0x21c   :  { %1267 = vst.msk [vmem:[%s2773_s2 + $0x338] sm:$0xff] %vm1163_vm0, %v1122_v7  ;;  %1266 = vst.msk [vmem:[%s2773_s2 + $0x330] sm:$0xff] %vm1163_vm0, %v1121_v8  ;;  %v1124_v13 = vmul.f32 %v827_v11, %v116_v9  ;;  %v1123_v14 = vmul.f32 %v822_v12, %v115_v10  ;;  %v927_v7 = vpop.permute.xlu1 %926  ;;  %v922_v8 = vpop.permute.xlu0 %921 }
 0x223   :  { %v118_v15 = vld [vmem:[%s2772_s0 + $0x358] sm:$0xff]  ;;  %v117_v16 = vld [vmem:[%s2772_s0 + $0x350] sm:$0xff] }
 0x224   :  { %1269 = vst.msk [vmem:[%s2773_s2 + $0x348] sm:$0xff] %vm1163_vm0, %v1124_v13  ;;  %1268 = vst.msk [vmem:[%s2773_s2 + $0x340] sm:$0xff] %vm1163_vm0, %v1123_v14  ;;  %v1126_v19 = vmul.f32 %v837_v17, %v118_v15  ;;  %v1125_v20 = vmul.f32 %v832_v18, %v117_v16  ;;  %v937_v13 = vpop.permute.xlu1 %936  ;;  %v932_v14 = vpop.permute.xlu0 %931 }
 0x22b   :  { %v120_v21 = vld [vmem:[%s2772_s0 + $0x368] sm:$0xff]  ;;  %v119_v22 = vld [vmem:[%s2772_s0 + $0x360] sm:$0xff] }
 0x22c   :  { %1271 = vst.msk [vmem:[%s2773_s2 + $0x358] sm:$0xff] %vm1163_vm0, %v1126_v19  ;;  %1270 = vst.msk [vmem:[%s2773_s2 + $0x350] sm:$0xff] %vm1163_vm0, %v1125_v20  ;;  %v1128_v25 = vmul.f32 %v847_v23, %v120_v21  ;;  %v1127_v26 = vmul.f32 %v842_v24, %v119_v22  ;;  %v947_v19 = vpop.permute.xlu1 %946  ;;  %v942_v20 = vpop.permute.xlu0 %941 }
 0x233   :  { %v122_v27 = vld [vmem:[%s2772_s0 + $0x378] sm:$0xff]  ;;  %v121_v28 = vld [vmem:[%s2772_s0 + $0x370] sm:$0xff] }
 0x234   :  { %1273 = vst.msk [vmem:[%s2773_s2 + $0x368] sm:$0xff] %vm1163_vm0, %v1128_v25  ;;  %1272 = vst.msk [vmem:[%s2773_s2 + $0x360] sm:$0xff] %vm1163_vm0, %v1127_v26  ;;  %v1130_v31 = vmul.f32 %v857_v29, %v122_v27  ;;  %v1129_v32 = vmul.f32 %v852_v30, %v121_v28  ;;  %v957_v25 = vpop.permute.xlu1 %956  ;;  %v952_v26 = vpop.permute.xlu0 %951 }
 0x23b   :  { %v124_v33 = vld [vmem:[%s2772_s0 + $0x388] sm:$0xff]  ;;  %v123_v34 = vld [vmem:[%s2772_s0 + $0x380] sm:$0xff] }
 0x23c   :  { %1275 = vst.msk [vmem:[%s2773_s2 + $0x378] sm:$0xff] %vm1163_vm0, %v1130_v31  ;;  %1274 = vst.msk [vmem:[%s2773_s2 + $0x370] sm:$0xff] %vm1163_vm0, %v1129_v32  ;;  %v1132_v37 = vmul.f32 %v867_v35, %v124_v33  ;;  %v1131_v38 = vmul.f32 %v862_v36, %v123_v34  ;;  %v967_v31 = vpop.permute.xlu1 %966  ;;  %v962_v32 = vpop.permute.xlu0 %961 }
 0x243   :  { %v126_v39 = vld [vmem:[%s2772_s0 + $0x398] sm:$0xff]  ;;  %v125_v40 = vld [vmem:[%s2772_s0 + $0x390] sm:$0xff] }
 0x244   :  { %1277 = vst.msk [vmem:[%s2773_s2 + $0x388] sm:$0xff] %vm1163_vm0, %v1132_v37  ;;  %1276 = vst.msk [vmem:[%s2773_s2 + $0x380] sm:$0xff] %vm1163_vm0, %v1131_v38  ;;  %v1134_v43 = vmul.f32 %v877_v41, %v126_v39  ;;  %v1133_v44 = vmul.f32 %v872_v42, %v125_v40  ;;  %v977_v37 = vpop.permute.xlu1 %976  ;;  %v972_v38 = vpop.permute.xlu0 %971 }
 0x24b   :  { %v128_v45 = vld [vmem:[%s2772_s0 + $0x3a8] sm:$0xff]  ;;  %v127_v46 = vld [vmem:[%s2772_s0 + $0x3a0] sm:$0xff] }
 0x24c   :  { %1279 = vst.msk [vmem:[%s2773_s2 + $0x398] sm:$0xff] %vm1163_vm0, %v1134_v43  ;;  %1278 = vst.msk [vmem:[%s2773_s2 + $0x390] sm:$0xff] %vm1163_vm0, %v1133_v44  ;;  %v1136_v49 = vmul.f32 %v887_v47, %v128_v45  ;;  %v1135_v50 = vmul.f32 %v882_v48, %v127_v46  ;;  %v987_v43 = vpop.permute.xlu1 %986  ;;  %v982_v44 = vpop.permute.xlu0 %981 }
 0x253   :  { %v130_v51 = vld [vmem:[%s2772_s0 + $0x3b8] sm:$0xff]  ;;  %v129_v52 = vld [vmem:[%s2772_s0 + $0x3b0] sm:$0xff] }
 0x254   :  { %1281 = vst.msk [vmem:[%s2773_s2 + $0x3a8] sm:$0xff] %vm1163_vm0, %v1136_v49  ;;  %1280 = vst.msk [vmem:[%s2773_s2 + $0x3a0] sm:$0xff] %vm1163_vm0, %v1135_v50  ;;  %v1138_v55 = vmul.f32 %v897_v53, %v130_v51  ;;  %v1137_v56 = vmul.f32 %v892_v54, %v129_v52  ;;  %v997_v49 = vpop.permute.xlu1 %996  ;;  %v992_v50 = vpop.permute.xlu0 %991 }
 0x25b   :  { %v132_v57 = vld [vmem:[%s2772_s0 + $0x3c8] sm:$0xff]  ;;  %v131_v58 = vld [vmem:[%s2772_s0 + $0x3c0] sm:$0xff] }
 0x25c   :  { %1283 = vst.msk [vmem:[%s2773_s2 + $0x3b8] sm:$0xff] %vm1163_vm0, %v1138_v55  ;;  %1282 = vst.msk [vmem:[%s2773_s2 + $0x3b0] sm:$0xff] %vm1163_vm0, %v1137_v56  ;;  %v1140_v61 = vmul.f32 %v907_v59, %v132_v57  ;;  %v1139_v62 = vmul.f32 %v902_v60, %v131_v58  ;;  %v1007_v55 = vpop.permute.xlu1 %1006  ;;  %v1002_v56 = vpop.permute.xlu0 %1001 }
 0x263   :  { %v134_v63 = vld [vmem:[%s2772_s0 + $0x3d8] sm:$0xff]  ;;  %v133_v0 = vld [vmem:[%s2772_s0 + $0x3d0] sm:$0xff] }
 0x264   :  { %1285 = vst.msk [vmem:[%s2773_s2 + $0x3c8] sm:$0xff] %vm1163_vm0, %v1140_v61  ;;  %1284 = vst.msk [vmem:[%s2773_s2 + $0x3c0] sm:$0xff] %vm1163_vm0, %v1139_v62  ;;  %v1142_v3 = vmul.f32 %v917_v1, %v134_v63  ;;  %v1141_v4 = vmul.f32 %v912_v2, %v133_v0  ;;  %v1017_v61 = vpop.permute.xlu1 %1016  ;;  %v1012_v62 = vpop.permute.xlu0 %1011 }
 0x26b   :  { %v136_v5 = vld [vmem:[%s2772_s0 + $0x3e8] sm:$0xff]  ;;  %v135_v6 = vld [vmem:[%s2772_s0 + $0x3e0] sm:$0xff] }
 0x26c   :  { %1287 = vst.msk [vmem:[%s2773_s2 + $0x3d8] sm:$0xff] %vm1163_vm0, %v1142_v3  ;;  %1286 = vst.msk [vmem:[%s2773_s2 + $0x3d0] sm:$0xff] %vm1163_vm0, %v1141_v4  ;;  %v1144_v9 = vmul.f32 %v927_v7, %v136_v5  ;;  %v1143_v10 = vmul.f32 %v922_v8, %v135_v6 }
 0x273   :  { %v138_v11 = vld [vmem:[%s2772_s0 + $0x3f8] sm:$0xff]  ;;  %v137_v12 = vld [vmem:[%s2772_s0 + $0x3f0] sm:$0xff] }
 0x274   :  { %1289 = vst.msk [vmem:[%s2773_s2 + $0x3e8] sm:$0xff] %vm1163_vm0, %v1144_v9  ;;  %1288 = vst.msk [vmem:[%s2773_s2 + $0x3e0] sm:$0xff] %vm1163_vm0, %v1143_v10  ;;  %v1146_v15 = vmul.f32 %v937_v13, %v138_v11  ;;  %v1145_v16 = vmul.f32 %v932_v14, %v137_v12 }
 0x27b   :  { %v140_v17 = vld [vmem:[%s2772_s0 + $0x408] sm:$0xff]  ;;  %v139_v18 = vld [vmem:[%s2772_s0 + $0x400] sm:$0xff] }
 0x27c   :  { %1291 = vst.msk [vmem:[%s2773_s2 + $0x3f8] sm:$0xff] %vm1163_vm0, %v1146_v15  ;;  %1290 = vst.msk [vmem:[%s2773_s2 + $0x3f0] sm:$0xff] %vm1163_vm0, %v1145_v16  ;;  %v1148_v21 = vmul.f32 %v947_v19, %v140_v17  ;;  %v1147_v22 = vmul.f32 %v942_v20, %v139_v18 }
 0x283   :  { %v142_v23 = vld [vmem:[%s2772_s0 + $0x418] sm:$0xff]  ;;  %v141_v24 = vld [vmem:[%s2772_s0 + $0x410] sm:$0xff] }
 0x284   :  { %1293 = vst.msk [vmem:[%s2773_s2 + $0x408] sm:$0xff] %vm1163_vm0, %v1148_v21  ;;  %1292 = vst.msk [vmem:[%s2773_s2 + $0x400] sm:$0xff] %vm1163_vm0, %v1147_v22  ;;  %v1150_v27 = vmul.f32 %v957_v25, %v142_v23  ;;  %v1149_v28 = vmul.f32 %v952_v26, %v141_v24 }
 0x28b   :  { %v144_v29 = vld [vmem:[%s2772_s0 + $0x428] sm:$0xff]  ;;  %v143_v30 = vld [vmem:[%s2772_s0 + $0x420] sm:$0xff] }
 0x28c   :  { %1295 = vst.msk [vmem:[%s2773_s2 + $0x418] sm:$0xff] %vm1163_vm0, %v1150_v27  ;;  %1294 = vst.msk [vmem:[%s2773_s2 + $0x410] sm:$0xff] %vm1163_vm0, %v1149_v28  ;;  %v1152_v33 = vmul.f32 %v967_v31, %v144_v29  ;;  %v1151_v34 = vmul.f32 %v962_v32, %v143_v30 }
 0x293   :  { %v146_v35 = vld [vmem:[%s2772_s0 + $0x438] sm:$0xff]  ;;  %v145_v36 = vld [vmem:[%s2772_s0 + $0x430] sm:$0xff] }
 0x294   :  { %1297 = vst.msk [vmem:[%s2773_s2 + $0x428] sm:$0xff] %vm1163_vm0, %v1152_v33  ;;  %1296 = vst.msk [vmem:[%s2773_s2 + $0x420] sm:$0xff] %vm1163_vm0, %v1151_v34  ;;  %v1154_v39 = vmul.f32 %v977_v37, %v146_v35  ;;  %v1153_v40 = vmul.f32 %v972_v38, %v145_v36 }
 0x29b   :  { %v148_v41 = vld [vmem:[%s2772_s0 + $0x448] sm:$0xff]  ;;  %v147_v42 = vld [vmem:[%s2772_s0 + $0x440] sm:$0xff] }
 0x29c   :  { %1299 = vst.msk [vmem:[%s2773_s2 + $0x438] sm:$0xff] %vm1163_vm0, %v1154_v39  ;;  %1298 = vst.msk [vmem:[%s2773_s2 + $0x430] sm:$0xff] %vm1163_vm0, %v1153_v40  ;;  %v1156_v45 = vmul.f32 %v987_v43, %v148_v41  ;;  %v1155_v46 = vmul.f32 %v982_v44, %v147_v42 }
 0x2a3   :  { %v150_v47 = vld [vmem:[%s2772_s0 + $0x458] sm:$0xff]  ;;  %v149_v48 = vld [vmem:[%s2772_s0 + $0x450] sm:$0xff] }
 0x2a4   :  { %1301 = vst.msk [vmem:[%s2773_s2 + $0x448] sm:$0xff] %vm1163_vm0, %v1156_v45  ;;  %1300 = vst.msk [vmem:[%s2773_s2 + $0x440] sm:$0xff] %vm1163_vm0, %v1155_v46  ;;  %v1158_v51 = vmul.f32 %v997_v49, %v150_v47  ;;  %v1157_v52 = vmul.f32 %v992_v50, %v149_v48 }
 0x2ab   :  { %v152_v53 = vld [vmem:[%s2772_s0 + $0x468] sm:$0xff]  ;;  %v151_v54 = vld [vmem:[%s2772_s0 + $0x460] sm:$0xff] }
 0x2ac   :  { %1303 = vst.msk [vmem:[%s2773_s2 + $0x458] sm:$0xff] %vm1163_vm0, %v1158_v51  ;;  %1302 = vst.msk [vmem:[%s2773_s2 + $0x450] sm:$0xff] %vm1163_vm0, %v1157_v52  ;;  %v1160_v57 = vmul.f32 %v1007_v55, %v152_v53  ;;  %v1159_v58 = vmul.f32 %v1002_v56, %v151_v54 }
 0x2b3   :  { %v154_v59 = vld [vmem:[%s2772_s0 + $0x478] sm:$0xff]  ;;  %v153_v60 = vld [vmem:[%s2772_s0 + $0x470] sm:$0xff] }
 0x2b4   :  { %1305 = vst.msk [vmem:[%s2773_s2 + $0x468] sm:$0xff] %vm1163_vm0, %v1160_v57  ;;  %1304 = vst.msk [vmem:[%s2773_s2 + $0x460] sm:$0xff] %vm1163_vm0, %v1159_v58  ;;  %v1162_v63 = vmul.f32 %v1017_v61, %v154_v59  ;;  %v1161_v0 = vmul.f32 %v1012_v62, %v153_v60 }
 0x2b6   :  { %1307 = vst.msk [vmem:[%s2773_s2 + $0x478] sm:$0xff] %vm1163_vm0, %v1162_v63  ;;  %1306 = vst.msk [vmem:[%s2773_s2 + $0x470] sm:$0xff] %vm1163_vm0, %v1161_v0 }

</bundles_post_ra>
